<compile_context>
chip_gen: v7x
topology: tpu7x:2x2x1
jax: 0.10.0
libtpu: 0.0.40
codegen_flags: <defaults>
</compile_context>

<pallas_src>
import functools

import jax
import jax.numpy as jnp
from jax.experimental import pallas as pl
from jax.experimental.pallas import tpu as pltpu


def _round_up(n, m):
    return ((n + m - 1) // m) * m


def _chip_tiling():
    """(destination-row tile, scoped-VMEM budget) per TPU generation."""
    try:
        info = pltpu.get_tpu_info()
        vmem = getattr(info, "vmem_capacity_bytes", None) or (64 * 1024 * 1024)
    except Exception:                       # be conservative if the query fails
        vmem = 64 * 1024 * 1024
    if vmem >= 100 * 1024 * 1024:           # v5e / v6e: 128 MiB VMEM
        return 512, 96 * 1024 * 1024
    return 256, 48 * 1024 * 1024            # v7x: 64 MiB VMEM (and unknown chips)


# ----------------------------------------------------------------------------
# Kernel 1: linear projection x' = x @ W, tiled (pipelined) over node rows
# ----------------------------------------------------------------------------
def _project_kernel(x_ref, w_ref, xw_ref):
    xw_ref[...] = jnp.dot(x_ref[...], w_ref[...],
                          preferred_element_type=jnp.float32).astype(xw_ref.dtype)


def gat_project(x_bf16, w_bf16, *, tile, vmem_limit):
    n_p, f_in = x_bf16.shape
    hf = w_bf16.shape[1]
    return pl.pallas_call(
        _project_kernel,
        out_shape=jax.ShapeDtypeStruct((n_p, hf), jnp.bfloat16),
        grid_spec=pltpu.PrefetchScalarGridSpec(
            num_scalar_prefetch=0,
            grid=(n_p // tile,),
            in_specs=[pl.BlockSpec((tile, f_in), lambda i: (i, 0)),   # x rows (streamed)
                      pl.BlockSpec((f_in, hf), lambda i: (0, 0))],    # W (resident)
            out_specs=pl.BlockSpec((tile, hf), lambda i: (i, 0)),
        ),
        compiler_params=pltpu.CompilerParams(
            dimension_semantics=("parallel",),
            vmem_limit_bytes=vmem_limit),
    )(x_bf16, w_bf16)


# ----------------------------------------------------------------------------
# Kernel 2: masked edge-softmax attention + aggregation, tiled over dest rows
# ----------------------------------------------------------------------------
def _gat_attn_kernel(xw_ref, asrc_ref, adst_ref, b_ref, adjb_ref, o_ref,
                     *, heads, f_out, f_aug, apply_elu):
    """One destination-row tile of one GATConv layer.

    xw_ref:   [Np, H*Faug] bf16  projected source features; per head the block is
                                 [F features | ones col | zero pad] (Faug=128-aligned)
    asrc_ref: [H,  Np]     f32   precomputed source attention scalars (transposed)
    adst_ref: [T,  H]      f32   precomputed destination attention scalars (this tile)
    b_ref:    [1,  H*F]    f32   bias (concat layout)
    adjb_ref: [T,  Np]     bf16  additive adjacency bias: 0 if edge (self-loops incl.),
                                 -1e30 otherwise
    o_ref:    [T,  H*F]
    """
    xw = xw_ref[...]                                    # bf16, resident
    adj_bias = adjb_ref[...].astype(jnp.float32)        # [T, Np], hoisted out of head loop
    a_src = asrc_ref[...]                               # [H, Np]
    a_dst = adst_ref[...]                               # [T, H]

    outs = []
    for h in range(heads):                              # heads is small & static -> unrolled
        e = a_dst[:, h:h + 1] + a_src[h:h + 1, :]       # [T, Np]
        e = jnp.maximum(e, 0.2 * e)                     # LeakyReLU(0.2), single VPU max
        logits = e + adj_bias                           # additive mask (no cmp/select)

        m = jnp.max(logits, axis=-1, keepdims=True)     # stable softmax
        p = jnp.exp(logits - m).astype(jnp.bfloat16)    # unnormalized probs, cast once

        # Aggregation; the trailing ones column yields the softmax denominator in
        # result column F -> no explicit cross-lane sum, normalization deferred.
        acc = jnp.dot(p, xw[:, h * f_aug:(h + 1) * f_aug],
                      preferred_element_type=jnp.float32)          # [T, Faug]
        out_h = acc[:, :f_out] * pl.reciprocal(acc[:, f_out:f_out + 1], approx=True)
        out_h = out_h + b_ref[0:1, h * f_out:(h + 1) * f_out]

        if apply_elu:                                   # F.elu(conv1(x)), alpha=1.0
            out_h = jnp.where(out_h > 0, out_h,
                              jnp.exp(jnp.minimum(out_h, 0.0)) - 1.0)
        outs.append(out_h)

    res = outs[0] if heads == 1 else jnp.concatenate(outs, axis=-1)
    o_ref[...] = res.astype(o_ref.dtype)                # single lane-dense store per tile


def gat_conv(xw_aug, adj_bias, a_src_t, a_dst, bias_row, *, heads, f_out, f_aug,
             apply_elu, tile, out_dtype, vmem_limit):
    n_p = xw_aug.shape[0]
    hf = heads * f_out
    kernel = functools.partial(_gat_attn_kernel, heads=heads, f_out=f_out,
                               f_aug=f_aug, apply_elu=apply_elu)
    return pl.pallas_call(
        kernel,
        out_shape=jax.ShapeDtypeStruct((n_p, hf), out_dtype),
        grid_spec=pltpu.PrefetchScalarGridSpec(
            num_scalar_prefetch=0,
            grid=(n_p // tile,),
            in_specs=[
                pl.BlockSpec((n_p, heads * f_aug), lambda i: (0, 0)),  # xw_aug (resident)
                pl.BlockSpec((heads, n_p), lambda i: (0, 0)),          # a_src^T (resident)
                pl.BlockSpec((tile, heads), lambda i: (i, 0)),         # a_dst (dest rows)
                pl.BlockSpec((1, hf), lambda i: (0, 0)),               # bias
                pl.BlockSpec((tile, n_p), lambda i: (i, 0)),           # adj bias (streamed)
            ],
            out_specs=pl.BlockSpec((tile, hf), lambda i: (i, 0)),
        ),
        compiler_params=pltpu.CompilerParams(
            dimension_semantics=("parallel",),           # megacore / per-core sharding
            vmem_limit_bytes=vmem_limit),
    )(xw_aug, a_src_t, a_dst, bias_row, adj_bias)


# ----------------------------------------------------------------------------
# One GATConv layer = projection kernel + (tiny XLA prep) + attention kernel
# ----------------------------------------------------------------------------
def _gat_layer(x_bf16, adj_bias, w, att_src, att_dst, bias, *, heads, f_out,
               apply_elu, tile, out_dtype, vmem_limit):
    n_p = x_bf16.shape[0]
    xw = gat_project(x_bf16, w.astype(jnp.bfloat16),
                     tile=tile, vmem_limit=vmem_limit)          # [Np, H*F] bf16

    # Precompute attention scalars once (tiny XLA ops) -> no per-tile recompute.
    xw3 = xw.reshape(n_p, heads, f_out).astype(jnp.float32)
    a_src_t = jnp.einsum('nhf,hf->hn', xw3, att_src)            # [H, Np]
    a_dst = jnp.einsum('nhf,hf->nh', xw3, att_dst)              # [Np, H]

    # Per-head feature block padded to a 128-lane multiple with a trailing ones
    # column at index F (folds the softmax denominator into the matmul; keeps
    # every in-kernel column slice lane-tile aligned).
    f_aug = _round_up(f_out + 1, 128)
    xw_aug = jnp.zeros((n_p, heads, f_aug), jnp.bfloat16)
    xw_aug = xw_aug.at[:, :, :f_out].set(xw.reshape(n_p, heads, f_out))
    xw_aug = xw_aug.at[:, :, f_out].set(jnp.bfloat16(1.0))
    xw_aug = xw_aug.reshape(n_p, heads * f_aug)

    return gat_conv(xw_aug, adj_bias, a_src_t, a_dst, bias.reshape(1, -1),
                    heads=heads, f_out=f_out, f_aug=f_aug, apply_elu=apply_elu,
                    tile=tile, out_dtype=out_dtype, vmem_limit=vmem_limit)


# ----------------------------------------------------------------------------
# Encoder = conv1 (+ELU) -> conv2
# ----------------------------------------------------------------------------
def gat_encoder(x, adj, params, *, heads, hidden):
    n = x.shape[0]
    tile_cfg, vmem_limit = _chip_tiling()
    tile = min(tile_cfg, _round_up(n, 8))
    n_p = _round_up(n, tile)
    if n_p != n:
        x = jnp.pad(x, ((0, n_p - n), (0, 0)))
        pad_idx = jnp.arange(n, n_p)
        adj = jnp.zeros((n_p, n_p), adj.dtype).at[:n, :n].set(adj)
        adj = adj.at[pad_idx, pad_idx].set(1.0)   # self-loops keep padded rows finite

    # Additive adjacency bias precomputed once in HBM (bf16 halves the dominant
    # N^2 HBM stream; -1e30 is representable in bf16).  Safe because every row
    # has a self-loop, so each softmax denominator is >= 1.
    adj_bias = jnp.where(adj > 0, 0.0, -1e30).astype(jnp.bfloat16)

    x_bf16 = x.astype(jnp.bfloat16)

    # x = F.elu(conv1(x, edge_index))  -- ELU fused into the attention kernel;
    # intermediate emitted in bf16 to halve HBM traffic into layer 2.
    h1 = _gat_layer(x_bf16, adj_bias, params['w1'], params['as1'], params['ad1'],
                    params['b1'], heads=heads, f_out=hidden, apply_elu=True,
                    tile=tile, out_dtype=jnp.bfloat16, vmem_limit=vmem_limit)

    # x = conv2(x, edge_index)  -- heads=1, f32 output
    h2 = _gat_layer(h1, adj_bias, params['w2'], params['as2'], params['ad2'],
                    params['b2'], heads=1, f_out=hidden, apply_elu=False,
                    tile=tile, out_dtype=jnp.float32, vmem_limit=vmem_limit)
    return h2[:n]


def edge_index_to_adj(edge_index, num_nodes):
    """Dense adjacency mask adj[dst, src] with self-loops (PyG add_self_loops=True)."""
    src, dst = edge_index[0], edge_index[1]
    adj = jnp.zeros((num_nodes, num_nodes), jnp.float32).at[dst, src].set(1.0)
    return jnp.maximum(adj, jnp.eye(num_nodes, dtype=jnp.float32))


def init_params(key, input_dim, hidden_dim, heads):
    ks = jax.random.split(key, 8)
    s = 0.1
    return {
        # conv1: GATConv(input_dim, hidden_dim, heads=heads)
        'w1':  s * jax.random.normal(ks[0], (input_dim, heads * hidden_dim), jnp.float32),
        'as1': s * jax.random.normal(ks[1], (heads, hidden_dim), jnp.float32),
        'ad1': s * jax.random.normal(ks[2], (heads, hidden_dim), jnp.float32),
        'b1':  s * jax.random.normal(ks[3], (heads, hidden_dim), jnp.float32),
        # conv2: GATConv(hidden_dim*heads, hidden_dim, heads=1)
        'w2':  s * jax.random.normal(ks[4], (heads * hidden_dim, hidden_dim), jnp.float32),
        'as2': s * jax.random.normal(ks[5], (1, hidden_dim), jnp.float32),
        'ad2': s * jax.random.normal(ks[6], (1, hidden_dim), jnp.float32),
        'b2':  s * jax.random.normal(ks[7], (1, hidden_dim), jnp.float32),
    }


if __name__ == "__main__":
    num_nodes, input_dim, hidden_dim, heads = 8, 4, 32, 2

    key = jax.random.PRNGKey(0)
    k_x, k_p = jax.random.split(key)

    # node features [N, F_in]
    x = jax.random.normal(k_x, (num_nodes, input_dim), jnp.float32)

    # small bidirectional ring graph: edge_index [2, 16]
    idx = jnp.arange(num_nodes)
    src = jnp.concatenate([idx, (idx + 1) % num_nodes])
    dst = jnp.concatenate([(idx + 1) % num_nodes, idx])
    edge_index = jnp.stack([src, dst], axis=0)

    adj = edge_index_to_adj(edge_index, num_nodes)
    params = init_params(k_p, input_dim, hidden_dim, heads)

    out = gat_encoder(x, adj, params, heads=heads, hidden=hidden_dim)
    out = jax.block_until_ready(out)

    assert out.shape == (num_nodes, hidden_dim)
    assert bool(jnp.all(jnp.isfinite(out)))
    print("KERNEL_OK")
</pallas_src>

<mosaic_0001>
module attributes {stable_mosaic.version = 11 : i64} {
  func.func @_project_kernel(%arg0: i32, %arg1: memref<8x4xbf16, #tpu.memory_space<vmem>>, %arg2: memref<4x64xbf16, #tpu.memory_space<vmem>>, %arg3: memref<8x64xbf16, #tpu.memory_space<vmem>>) attributes {dimension_semantics = [#tpu.dimension_semantics<parallel>], iteration_bounds = array<i64: 1>, scalar_prefetch = 0 : i64, scratch_operands = 0 : i64, tpu.core_type = #tpu.core_type<tc>, window_params = [{transform_indices = @transform_0, window_bounds = array<i64: 8, 4>}, {pipeline_mode = #tpu.pipeline_mode<synchronous>, transform_indices = @transform_1, window_bounds = array<i64: 4, 64>}, {transform_indices = @transform_2, window_bounds = array<i64: 8, 64>}]} {
    %c0 = arith.constant 0 : index
    %c0_0 = arith.constant 0 : index
    %0 = vector.load %arg1[%c0, %c0_0] : memref<8x4xbf16, #tpu.memory_space<vmem>>, vector<8x4xbf16>
    %c0_1 = arith.constant 0 : index
    %c0_2 = arith.constant 0 : index
    %1 = vector.load %arg2[%c0_1, %c0_2] : memref<4x64xbf16, #tpu.memory_space<vmem>>, vector<4x64xbf16>
    %cst = arith.constant dense<0.000000e+00> : vector<8x64xf32>
    %2 = tpu.matmul %0, %1, %cst {dimension_numbers = #tpu.dot_dimension_numbers<[1], [0], [0], [1], [0, 0, 1, 1], [], []>} : vector<8x4xbf16>, vector<4x64xbf16>, vector<8x64xf32> -> vector<8x64xf32>
    %3 = arith.truncf %2 : vector<8x64xf32> to vector<8x64xbf16>
    %c0_3 = arith.constant 0 : index
    %c0_4 = arith.constant 0 : index
    %4 = vector.load %arg3[%c0_3, %c0_4] : memref<8x64xbf16, #tpu.memory_space<vmem>>, vector<8x64xbf16>
    tpu.vector_store %arg3[%c0_3, %c0_4], %3 {strides = array<i32>} : memref<8x64xbf16, #tpu.memory_space<vmem>>, vector<8x64xbf16>,
    return
  }
  func.func @transform_0(%arg0: i32) -> (i32, i32) {
    %c0_i32 = arith.constant 0 : i32
    %c0_i32_0 = arith.constant 0 : i32
    return %arg0, %c0_i32 : i32, i32
  }
  func.func @transform_1(%arg0: i32) -> (i32, i32) {
    %c0_i32 = arith.constant 0 : i32
    %c0_i32_0 = arith.constant 0 : i32
    %c0_i32_1 = arith.constant 0 : i32
    return %c0_i32, %c0_i32_0 : i32, i32
  }
  func.func @transform_2(%arg0: i32) -> (i32, i32) {
    %c0_i32 = arith.constant 0 : i32
    %c0_i32_0 = arith.constant 0 : i32
    return %arg0, %c0_i32 : i32, i32
  }
}

</mosaic_0001>

<bundles_post_ra>
// kernel: tpu_custom_call.1
= control target key start
LH: loop header
LB: loop body
LE: loop exit
PB: predicated region body
PF: predicated region fallthrough
CT: control target
= control target key end

     0   :  { %vm19_vm0 = vcmask 1041408   ;;  %v116_v1 = vmov 0.0   ;;  %vm117_vm1 = vmmov 0   ;;  %s152_s0 = inlined_call_operand.vmem [shape: bf16[8,4], index: 0, kind: input, shape index: {}]   ;;  %s153_s1 = inlined_call_operand.vmem [shape: bf16[4,64], index: 1, kind: input, shape index: {}]   ;;  %s154_s2 = inlined_call_operand.hbm [shape: bf16[8,64], index: 2, kind: output, shape index: {}]  }
   0x1   :  { %v14_v0 = vld [vmem:[%s153_s1] sm:$0x3]  ;;  %83 = vmatprep.subr.bf16.mxu0 %v116_v1  ;;  %85 = vmatprep.mubr.msk.bf16.mxu0 %vm117_vm1, %v116_v1 }
   0x2   :  { %v21_v2 = vsel %vm19_vm0, %v14_v0, 0 }
   0x3   :  { %7 = vsyncpa [#allocation3], 0  ;;  %84 = vmatpush3.bf16.msra.mxu0 %v21_v2  ;;  %v13_v3 = vld [vmem:[%s152_s0] sm:$0xf]  ;;  %vm15_vm2 = vcmask 31744   ;;  %s118_s13 = smov [#allocation2]  }
   0x4   :  { %s72_s14 = sshll.u32 %s118_s13, 4  ;;  %vm64_vm3 = vcmask 519168   ;;  %s73_s14 = int_to_ptr.vmem [resolvable:$true] %s72_s14 }
   0x5   :  { %s92_s1 = scalar_lea.vmem %s73_s14, 64  ;;  %p97_p1 = scmp.lt.s32.totalorder %s73_s14, %s73_s14 }
   0x6   :  { %86 = vmatmul.mubr.msk.bf16.vlgmr.msra.gmra.mrb[0].mxu0 %vm15_vm2, %v13_v3  ;;  %p93_p0 = scmp.ne.s32.totalorder %s73_s14, %s92_s1  ;;  %p98_p2 = scmp.lt.s32.totalorder %s92_s1, %s92_s1 }
   0x8   :  { %p99_p3 = por %p98_p2, %p97_p1 }
   0xa   :  { %p100_p4 = pnand %p99_p3, %p93_p0 }
  0xd9   :  { %v57_v4 = vpop.f32.mrb[0].mxu0 }
  0xda   :  { %v63_v5 = vpack.c.bf16 %v57_v4, %v57_v4  ;;  %v87_v6 = vpop.f32.mrb[1].mxu0 }
  0xdb   :  { %v60_v7 = vpop.f32.mrb[2].mxu0 }
  0xdc   :  { %v88_v8 = vpop.f32.mrb[3].mxu0  ;;  %65 = vst.msk [vmem:[#allocation2] sm:$0xf] %vm64_vm3, %v63_v5 }
  0xdd   :  { %103 = shalt.err (!%p100_p4)
}
  0xde   :  { %s104_s16 = scalar_lea.hbm %s154_s2, 64 }
  0xdf   :  { %p105_p5 = scmp.ne.s32.totalorder %s154_s2, %s104_s16  ;;  %p108_p6 = scmp.lt.u32.totalorder %s104_s16, %s154_s2 }
  0xe1   :  { %p110_p7 = pnand %p108_p6, %p105_p5 }
  0xe3   :  { %113 = shalt.err (!%p110_p7)
}
  0xe4   :  { %75 = dma.vmem_to_hbm [thread:$0]  %s73_s14, 64, %s154_s2, [#allocation3]  }
  0xe5   :  { %114 = dma.done.wait [#allocation3], 64  }
  0xe6   :  { %115 = vsyncadd [#allocation3], 4294967232 }
  0xe7   :  { %79 = vsyncpa [#allocation3], 1 }

</bundles_post_ra>
